<compile_context>
chip_gen: v7x
topology: tpu7x:2x2x1
jax: 0.10.0
libtpu: 0.0.40
codegen_flags: <defaults>
</compile_context>

<pallas_src>
import jax
import jax.numpy as jnp
from jax.experimental import pallas as pl
from jax.experimental.pallas import tpu as pltpu

# ----------------------------- configuration -----------------------------
B, L, H = 2, 8, 32          # batch, seq_len, hidden_size (toy sizes for the demo)
VOCAB = 50
REL_SIZE = 4
SHAKING_TYPE = "cat"        # handshaking variant implemented in the Pallas kernel
DIST_EMB_SIZE = L           # == seq_len so the distance segments line up
ENT_ADD_DIST = True
REL_ADD_DIST = True

P_PAIRS = L * (L + 1) // 2          # number of (i <= j) pairs
O_TOTAL = 2 + 6 * REL_SIZE          # ent(2) + head_rel(3R) + tail_rel(3R) = 26
O_PAD = 128                         # lane-dense combined-head output width
TP_MAX = 512                        # pair-tile rows; sized so double-buffered (TP,128) f32
                                    # output + gathers fit v7x's 64 MiB VMEM at large L


def _round_up(x, m):
    return (x + m - 1) // m * m


P_PAD8 = _round_up(P_PAIRS, 8)      # sublane-aligned pair count
TP = min(TP_MAX, P_PAD8)            # pair-tile size (multiple of 8)
P_PAD = _round_up(P_PAIRS, TP)      # padded pair count (multiple of TP)
NP = P_PAD // TP                    # number of pair tiles in the grid


# ============================ fused Pallas kernel =============================
def _tplinker_fused_kernel(pi_ref, pd_ref, seq_ref, wct_ref, cb_ref, wh_ref,
                           dist_ref, out_ref):
    """One (batch, pair-tile) step of handshaking('cat') + dist add + all heads.

    pi_ref  : (TP, 1)   int32  pair row index i for each pair row in this tile
    pd_ref  : (TP, 1)   int32  pair distance d = j - i
    seq_ref : (L, H)    bf16   encoder hidden states for this batch element
    wct_ref : (H, 2H)   bf16   [W1^T | W2^T] of combine_fc (W1 acts on h_i, W2 on h_j)
    cb_ref  : (1, H)    f32    combine_fc bias
    wh_ref  : (H, 128)  bf16   [ent | head_rel | tail_rel] weights, zero-padded to 128 lanes
    dist_ref: (L, 128)  f32    head bias + dist_emb folded through the heads, row d = j - i
    out_ref : (TP, 128) f32    lane/sublane-dense combined head outputs
    """
    L_, H_ = seq_ref.shape
    TP_ = out_ref.shape[0]

    # (a) merged handshaking projections: one MXU matmul, bf16 operands, f32 accumulate.
    pq = jnp.dot(seq_ref[...], wct_ref[...], preferred_element_type=jnp.float32)   # (L, 2H)
    p = (pq[:, :H_] + cb_ref[...]).astype(jnp.bfloat16)    # combine bias folded ONCE
    q = pq[:, H_:].astype(jnp.bfloat16)

    # (b) dense upper-triangular pair rows via one-hot row-gather MXU matmuls, built
    #     in-VMEM from the tiny per-tile index tables -- no per-row loop, no masked stores.
    lane = jax.lax.broadcasted_iota(jnp.int32, (TP_, L_), 1)
    pi = pi_ref[...]                                                     # (TP, 1)
    pd = pd_ref[...]                                                     # (TP, 1)
    sel_i = jnp.where(lane == pi, 1.0, 0.0).astype(jnp.bfloat16)         # (TP, L)
    sel_j = jnp.where(lane == pi + pd, 1.0, 0.0).astype(jnp.bfloat16)    # (TP, L)
    sel_d = jnp.where(lane == pd, 1.0, 0.0)                              # (TP, L) f32 (exact)

    p_rows = jnp.dot(sel_i, p, preferred_element_type=jnp.float32)       # (TP, H)
    q_rows = jnp.dot(sel_j, q, preferred_element_type=jnp.float32)       # (TP, H)
    seg = jnp.tanh(p_rows + q_rows)                                      # (TP, H), one tanh

    # (c) ent + all head/tail rel heads in ONE lane-dense matmul, plus the exact
    #     (head bias + distance) contribution gathered by d = j - i; one aligned store.
    heads = jnp.dot(seg.astype(jnp.bfloat16), wh_ref[...],
                    preferred_element_type=jnp.float32)                  # (TP, 128)
    bias_dist = jnp.dot(sel_d, dist_ref[...], preferred_element_type=jnp.float32)
    out_ref[...] = heads + bias_dist


def fused_shaking_heads(seq_bf16, fw):
    B_ = seq_bf16.shape[0]
    return pl.pallas_call(
        _tplinker_fused_kernel,
        out_shape=jax.ShapeDtypeStruct((B_, P_PAD, O_PAD), jnp.float32),
        grid=(B_, NP),
        in_specs=[
            pl.BlockSpec((TP, 1), lambda b, t: (t, 0)),           # pair row index i
            pl.BlockSpec((TP, 1), lambda b, t: (t, 0)),           # pair distance d = j - i
            pl.BlockSpec((None, L, H), lambda b, t: (b, 0, 0)),   # seq (batch dim squeezed)
            pl.BlockSpec((H, 2 * H), lambda b, t: (0, 0)),        # merged combine weight
            pl.BlockSpec((1, H), lambda b, t: (0, 0)),            # combine bias
            pl.BlockSpec((H, O_PAD), lambda b, t: (0, 0)),        # merged head weight (padded)
            pl.BlockSpec((L, O_PAD), lambda b, t: (0, 0)),        # bias+dist table (O(L), not O(L^2))
        ],
        out_specs=pl.BlockSpec((None, TP, O_PAD), lambda b, t: (b, t, 0)),
        compiler_params=pltpu.CompilerParams(
            dimension_semantics=("parallel", "parallel")),
    )(fw["pair_i"], fw["pair_d"], seq_bf16,
      fw["wct"], fw["cb"], fw["wh"], fw["dist_tab"])


# ===================== plain-JAX glue: encoder stand-in ==================
def _layer_norm(x, g, b, eps=1e-12):
    mu = jnp.mean(x, axis=-1, keepdims=True)
    var = jnp.mean((x - mu) ** 2, axis=-1, keepdims=True)
    return (x - mu) / jnp.sqrt(var + eps) * g + b


def encoder_forward(p, input_ids, attention_mask, token_type_ids):
    # TODO(synk): the pretrained BERT encoder is an injected constructor dependency; a
    # deterministic single-layer BERT-style encoder is used as a stand-in in plain JAX.
    x = (p["word_emb"][input_ids]
         + p["pos_emb"][None, : input_ids.shape[1], :]
         + p["type_emb"][token_type_ids])
    x = _layer_norm(x, p["ln_emb_g"], p["ln_emb_b"])

    q = x @ p["wq"] + p["bq"]
    k = x @ p["wk"] + p["bk"]
    v = x @ p["wv"] + p["bv"]
    scores = (q @ jnp.swapaxes(k, -1, -2)) / jnp.sqrt(float(H))
    mask_bias = (1.0 - attention_mask[:, None, :].astype(jnp.float32)) * -1e9
    attn = jax.nn.softmax(scores + mask_bias, axis=-1) @ v
    x = _layer_norm(x + attn @ p["wo"] + p["bo"], p["ln1_g"], p["ln1_b"])
    ff = jax.nn.gelu(x @ p["w_ff1"] + p["b_ff1"]) @ p["w_ff2"] + p["b_ff2"]
    x = _layer_norm(x + ff, p["ln2_g"], p["ln2_b"])
    return x


def build_dist_emb():
    d = jnp.arange(DIST_EMB_SIZE, dtype=jnp.float32)[:, None]
    i = jnp.arange(H)
    expnt = jnp.where(i % 2 == 0, i, i - 1).astype(jnp.float32) / H
    angle = d / (10000.0 ** expnt)[None, :]
    return jnp.where((i % 2 == 0)[None, :], jnp.sin(angle), jnp.cos(angle))   # (D, H)


# ============================ parameter init =============================
def init_params(key):
    ks = jax.random.split(key, 20)

    def n(i, shape, scale):
        return scale * jax.random.normal(ks[i], shape, dtype=jnp.float32)

    enc = dict(
        word_emb=n(0, (VOCAB, H), 0.02), pos_emb=n(1, (L, H), 0.02), type_emb=n(2, (2, H), 0.02),
        ln_emb_g=jnp.ones((H,), jnp.float32), ln_emb_b=jnp.zeros((H,), jnp.float32),
        wq=n(3, (H, H), 0.02), bq=jnp.zeros((H,), jnp.float32),
        wk=n(4, (H, H), 0.02), bk=jnp.zeros((H,), jnp.float32),
        wv=n(5, (H, H), 0.02), bv=jnp.zeros((H,), jnp.float32),
        wo=n(6, (H, H), 0.02), bo=jnp.zeros((H,), jnp.float32),
        ln1_g=jnp.ones((H,), jnp.float32), ln1_b=jnp.zeros((H,), jnp.float32),
        w_ff1=n(7, (H, 4 * H), 0.02), b_ff1=jnp.zeros((4 * H,), jnp.float32),
        w_ff2=n(8, (4 * H, H), 0.02), b_ff2=jnp.zeros((H,), jnp.float32),
        ln2_g=jnp.ones((H,), jnp.float32), ln2_b=jnp.zeros((H,), jnp.float32),
    )
    s = 0.1   # TPLinker head scale (keeps logits O(1) so the bf16-MXU check stays meaningful)
    return dict(
        encoder=enc,
        combine_w=n(9, (H, 2 * H), s),                    # nn.Linear(2H, H).weight -> (H, 2H)
        combine_b=n(10, (H,), s),
        ent_w=n(11, (2, H), s), ent_b=n(12, (2,), s),     # nn.Linear(H, 2)
        head_rel_w=n(13, (REL_SIZE, 3, H), s), head_rel_b=n(14, (REL_SIZE, 3), s),
        tail_rel_w=n(15, (REL_SIZE, 3, H), s), tail_rel_b=n(16, (REL_SIZE, 3), s),
    )


# ================== one-time weight re-layout for the fused kernel =======
def prepare_fused_weights(params):
    """Precompute merged / padded / bf16-cast weights and pair index tables once."""
    # combine_fc: torch Linear(2H, H).weight is (H, 2H); out = cat([h_i, h_j]) @ W^T + b
    cw = params["combine_w"]
    wct = jnp.concatenate([cw[:, :H].T, cw[:, H:].T], axis=1)             # (H, 2H) = [W1^T | W2^T]
    cb = params["combine_b"][None, :].astype(jnp.float32)                 # (1, H)

    R = REL_SIZE
    ent_wt = params["ent_w"].T                                            # (H, 2)
    head_wt = params["head_rel_w"].reshape(3 * R, H).T                    # (H, 3R)
    tail_wt = params["tail_rel_w"].reshape(3 * R, H).T                    # (H, 3R)
    wh = jnp.concatenate([ent_wt, head_wt, tail_wt], axis=1)              # (H, 26)
    bh = jnp.concatenate([params["ent_b"],
                          params["head_rel_b"].reshape(-1),
                          params["tail_rel_b"].reshape(-1)], axis=0)      # (26,)

    # (L, 128) bias + distance table, indexed by d = j - i.  The distance embedding is added
    # AFTER tanh in the reference, so folding it (and the head biases) through the linear
    # heads is exact:  (seg + dist) @ W + b  ==  seg @ W + (dist @ W_flag + b).
    tab = jnp.broadcast_to(bh[None, :], (L, O_TOTAL))
    if DIST_EMB_SIZE != -1:
        dist_emb = build_dist_emb()[:L]                                   # row d == distance j - i
        ent_f = 1.0 if ENT_ADD_DIST else 0.0
        rel_f = 1.0 if REL_ADD_DIST else 0.0
        tab = tab + jnp.concatenate([ent_f * (dist_emb @ ent_wt),
                                     rel_f * (dist_emb @ head_wt),
                                     rel_f * (dist_emb @ tail_wt)], axis=1)
    dist_tab = jnp.zeros((L, O_PAD), jnp.float32).at[:, :O_TOTAL].set(tab)

    # Zero-pad the merged head weight to 128 lanes -> unmasked lane-dense store in the kernel.
    wh_pad = jnp.zeros((H, O_PAD), jnp.float32).at[:, :O_TOTAL].set(wh)

    # Upper-triangular pair index tables in the reference torch.cat order (row-major, i <= j),
    # padded to P_PAD rows (padding rows point at pair (0,0) and are sliced off in the wrapper).
    iu, ju = jnp.triu_indices(L)
    pair_i = jnp.zeros((P_PAD, 1), jnp.int32).at[:P_PAIRS, 0].set(iu.astype(jnp.int32))
    pair_d = jnp.zeros((P_PAD, 1), jnp.int32).at[:P_PAIRS, 0].set((ju - iu).astype(jnp.int32))

    return {
        "wct": wct.astype(jnp.bfloat16),     # bf16 MXU operands (v6e/v7x peak; fine on v5e MXU)
        "cb": cb,                            # f32: bias add / tanh stay on the f32 VPU path
        "wh": wh_pad.astype(jnp.bfloat16),
        "dist_tab": dist_tab,                # f32: distance/bias fold stays exact
        "pair_i": pair_i,
        "pair_d": pair_d,
    }


# ============================ TPLinker forward ===========================
def tplinker_forward(params, fused_w, inputs):
    last_hidden_state = encoder_forward(
        params["encoder"], inputs["input_ids"], inputs["attention_mask"],
        inputs["token_type_ids"])

    # ---- single fused Pallas kernel: handshaking + dist + all heads ----
    fused = fused_shaking_heads(last_hidden_state.astype(jnp.bfloat16), fused_w)  # (B, P_pad, 128)
    fused = fused[:, :P_PAIRS, :]                                                 # drop pair padding

    R = REL_SIZE
    Bsz = fused.shape[0]
    ent_out = fused[..., :2]                                                       # (B, P, 2)
    head_rel = fused[..., 2:2 + 3 * R].reshape(Bsz, P_PAIRS, R, 3).transpose(0, 2, 1, 3)
    tail_rel = fused[..., 2 + 3 * R:2 + 6 * R].reshape(Bsz, P_PAIRS, R, 3).transpose(0, 2, 1, 3)
    # TODO(synk): the transpose to torch's (B, R, P, 3) layout is only to match the reference
    # output layout; consumers that accept (B, P, R, 3) can skip it.
    return {
        "ent_shaking_outputs": ent_out,                 # (B, P, 2)
        "head_rel_shaking_outputs": head_rel,           # (B, R, P, 3)
        "tail_rel_shaking_outputs": tail_rel,           # (B, R, P, 3)
    }


# ================== pure-JAX line-by-line reference (check) ==============
def reference_forward(params, inputs):
    x = encoder_forward(params["encoder"], inputs["input_ids"],
                        inputs["attention_mask"], inputs["token_type_ids"])
    cw, cb = params["combine_w"], params["combine_b"]
    segs = []
    for ind in range(L):
        h_i = x[:, ind, :]
        vis = x[:, ind:, :]
        rep = jnp.broadcast_to(h_i[:, None, :], vis.shape)
        cat = jnp.concatenate([rep, vis], axis=-1)
        segs.append(jnp.tanh(cat @ cw.T + cb))
    shaking = jnp.concatenate(segs, axis=1)

    s4ent, s4rel = shaking, shaking
    if DIST_EMB_SIZE != -1:
        dist_emb = build_dist_emb()
        dist_seq = jnp.concatenate([dist_emb[:a] for a in range(L, 0, -1)], axis=0)
        if ENT_ADD_DIST:
            s4ent = shaking + dist_seq[None, :, :]
        if REL_ADD_DIST:
            s4rel = shaking + dist_seq[None, :, :]

    ent = s4ent @ params["ent_w"].T + params["ent_b"]
    head = jnp.stack([s4rel @ params["head_rel_w"][r].T + params["head_rel_b"][r]
                      for r in range(REL_SIZE)], axis=1)
    tail = jnp.stack([s4rel @ params["tail_rel_w"][r].T + params["tail_rel_b"][r]
                      for r in range(REL_SIZE)], axis=1)
    return {"ent_shaking_outputs": ent,
            "head_rel_shaking_outputs": head,
            "tail_rel_shaking_outputs": tail}


# ================================= main ==================================
if __name__ == "__main__":
    key = jax.random.PRNGKey(0)
    pk, ik = jax.random.split(key)
    params = init_params(pk)
    fused_w = prepare_fused_weights(params)      # one-time weight re-layout

    input_ids = jax.random.randint(ik, (B, L), 0, VOCAB, dtype=jnp.int32)
    attention_mask = (jnp.arange(L)[None, :] < jnp.array([[L], [L - 2]])).astype(jnp.int32)
    token_type_ids = jnp.zeros((B, L), dtype=jnp.int32)
    inputs = {"input_ids": input_ids,
              "attention_mask": attention_mask,
              "token_type_ids": token_type_ids}

    outs = tplinker_forward(params, fused_w, inputs)
    jax.block_until_ready(outs)

    ref = reference_forward(params, inputs)
    # bf16 MXU operands inside the kernel -> relaxed tolerance (reference outputs are O(0.5),
    # so a structural/ordering bug would blow far past this while bf16 rounding stays ~1e-2).
    for name in outs:
        assert outs[name].shape == ref[name].shape, (name, outs[name].shape, ref[name].shape)
        err = float(jnp.max(jnp.abs(outs[name] - ref[name])))
        assert err < 5e-2, (name, err)

    print("KERNEL_OK")
</pallas_src>

<mosaic_0001>
module attributes {stable_mosaic.version = 11 : i64} {
  func.func @_tplinker_fused_kernel(%arg0: i32, %arg1: i32, %arg2: memref<40x1xi32, #tpu.memory_space<vmem>>, %arg3: memref<40x1xi32, #tpu.memory_space<vmem>>, %arg4: memref<1x8x32xbf16, #tpu.memory_space<vmem>>, %arg5: memref<32x64xbf16, #tpu.memory_space<vmem>>, %arg6: memref<1x32xf32, #tpu.memory_space<vmem>>, %arg7: memref<32x128xbf16, #tpu.memory_space<vmem>>, %arg8: memref<8x128xf32, #tpu.memory_space<vmem>>, %arg9: memref<1x40x128xf32, #tpu.memory_space<vmem>>) attributes {dimension_semantics = [#tpu.dimension_semantics<parallel>, #tpu.dimension_semantics<parallel>], iteration_bounds = array<i64: 2, 1>, scalar_prefetch = 0 : i64, scratch_operands = 0 : i64, tpu.core_type = #tpu.core_type<tc>, window_params = [{transform_indices = @transform_0, window_bounds = array<i64: 40, 1>}, {transform_indices = @transform_1, window_bounds = array<i64: 40, 1>}, {transform_indices = @transform_2, window_bounds = array<i64: 1, 8, 32>}, {pipeline_mode = #tpu.pipeline_mode<synchronous>, transform_indices = @transform_3, window_bounds = array<i64: 32, 64>}, {pipeline_mode = #tpu.pipeline_mode<synchronous>, transform_indices = @transform_4, window_bounds = array<i64: 1, 32>}, {pipeline_mode = #tpu.pipeline_mode<synchronous>, transform_indices = @transform_5, window_bounds = array<i64: 32, 128>}, {pipeline_mode = #tpu.pipeline_mode<synchronous>, transform_indices = @transform_6, window_bounds = array<i64: 8, 128>}, {transform_indices = @transform_7, window_bounds = array<i64: 1, 40, 128>}]} {
    %c0 = arith.constant 0 : index
    %c0_0 = arith.constant 0 : index
    %c0_1 = arith.constant 0 : index
    %0 = vector.load %arg4[%c0, %c0_0, %c0_1] : memref<1x8x32xbf16, #tpu.memory_space<vmem>>, vector<1x8x32xbf16>
    %1 = vector.shape_cast %0 : vector<1x8x32xbf16> to vector<8x32xbf16>
    %c0_2 = arith.constant 0 : index
    %c0_3 = arith.constant 0 : index
    %2 = vector.load %arg5[%c0_2, %c0_3] : memref<32x64xbf16, #tpu.memory_space<vmem>>, vector<32x64xbf16>
    %cst = arith.constant dense<0.000000e+00> : vector<8x64xf32>
    %3 = tpu.matmul %1, %2, %cst {dimension_numbers = #tpu.dot_dimension_numbers<[1], [0], [0], [1], [0, 0, 1, 1], [], []>} : vector<8x32xbf16>, vector<32x64xbf16>, vector<8x64xf32> -> vector<8x64xf32>
    %4 = vector.extract_strided_slice %3 {offsets = [0, 0], sizes = [8, 32], strides = [1, 1]} : vector<8x64xf32> to vector<8x32xf32>
    %c0_4 = arith.constant 0 : index
    %c0_5 = arith.constant 0 : index
    %5 = vector.load %arg6[%c0_4, %c0_5] : memref<1x32xf32, #tpu.memory_space<vmem>>, vector<1x32xf32>
    %6 = vector.broadcast %5 : vector<1x32xf32> to vector<8x32xf32>
    %7 = arith.addf %4, %6 : vector<8x32xf32>
    %8 = arith.truncf %7 : vector<8x32xf32> to vector<8x32xbf16>
    %9 = vector.extract_strided_slice %3 {offsets = [0, 32], sizes = [8, 32], strides = [1, 1]} : vector<8x64xf32> to vector<8x32xf32>
    %10 = arith.truncf %9 : vector<8x32xf32> to vector<8x32xbf16>
    %11 = tpu.iota {dimensions = array<i32: 1>} : vector<40x8xi32>
    %c0_6 = arith.constant 0 : index
    %c0_7 = arith.constant 0 : index
    %12 = vector.load %arg2[%c0_6, %c0_7] : memref<40x1xi32, #tpu.memory_space<vmem>>, vector<40x1xi32>
    %c0_8 = arith.constant 0 : index
    %c0_9 = arith.constant 0 : index
    %13 = vector.load %arg3[%c0_8, %c0_9] : memref<40x1xi32, #tpu.memory_space<vmem>>, vector<40x1xi32>
    %14 = vector.broadcast %12 : vector<40x1xi32> to vector<40x8xi32>
    %15 = arith.cmpi eq, %11, %14 : vector<40x8xi32>
    %cst_10 = arith.constant 1.000000e+00 : f32
    %cst_11 = arith.constant 0.000000e+00 : f32
    %16 = vector.broadcast %cst_10 : f32 to vector<40x8xf32>
    %17 = vector.broadcast %cst_11 : f32 to vector<40x8xf32>
    %18 = arith.select %15, %16, %17 : vector<40x8xi1>, vector<40x8xf32>
    %19 = arith.truncf %18 : vector<40x8xf32> to vector<40x8xbf16>
    %20 = arith.addi %12, %13 : vector<40x1xi32>
    %21 = vector.broadcast %20 : vector<40x1xi32> to vector<40x8xi32>
    %22 = arith.cmpi eq, %11, %21 : vector<40x8xi32>
    %cst_12 = arith.constant 1.000000e+00 : f32
    %cst_13 = arith.constant 0.000000e+00 : f32
    %23 = vector.broadcast %cst_12 : f32 to vector<40x8xf32>
    %24 = vector.broadcast %cst_13 : f32 to vector<40x8xf32>
    %25 = arith.select %22, %23, %24 : vector<40x8xi1>, vector<40x8xf32>
    %26 = arith.truncf %25 : vector<40x8xf32> to vector<40x8xbf16>
    %27 = vector.broadcast %13 : vector<40x1xi32> to vector<40x8xi32>
    %28 = arith.cmpi eq, %11, %27 : vector<40x8xi32>
    %cst_14 = arith.constant 1.000000e+00 : f32
    %cst_15 = arith.constant 0.000000e+00 : f32
    %29 = vector.broadcast %cst_14 : f32 to vector<40x8xf32>
    %30 = vector.broadcast %cst_15 : f32 to vector<40x8xf32>
    %31 = arith.select %28, %29, %30 : vector<40x8xi1>, vector<40x8xf32>
    %cst_16 = arith.constant dense<0.000000e+00> : vector<40x32xf32>
    %32 = tpu.matmul %19, %8, %cst_16 {dimension_numbers = #tpu.dot_dimension_numbers<[1], [0], [0], [1], [0, 0, 1, 1], [], []>} : vector<40x8xbf16>, vector<8x32xbf16>, vector<40x32xf32> -> vector<40x32xf32>
    %cst_17 = arith.constant dense<0.000000e+00> : vector<40x32xf32>
    %33 = tpu.matmul %26, %10, %cst_17 {dimension_numbers = #tpu.dot_dimension_numbers<[1], [0], [0], [1], [0, 0, 1, 1], [], []>} : vector<40x8xbf16>, vector<8x32xbf16>, vector<40x32xf32> -> vector<40x32xf32>
    %34 = arith.addf %32, %33 : vector<40x32xf32>
    %35 = math.tanh %34 : vector<40x32xf32>
    %36 = arith.truncf %35 : vector<40x32xf32> to vector<40x32xbf16>
    %c0_18 = arith.constant 0 : index
    %c0_19 = arith.constant 0 : index
    %37 = vector.load %arg7[%c0_18, %c0_19] : memref<32x128xbf16, #tpu.memory_space<vmem>>, vector<32x128xbf16>
    %cst_20 = arith.constant dense<0.000000e+00> : vector<40x128xf32>
    %38 = tpu.matmul %36, %37, %cst_20 {dimension_numbers = #tpu.dot_dimension_numbers<[1], [0], [0], [1], [0, 0, 1, 1], [], []>} : vector<40x32xbf16>, vector<32x128xbf16>, vector<40x128xf32> -> vector<40x128xf32>
    %c0_21 = arith.constant 0 : index
    %c0_22 = arith.constant 0 : index
    %39 = vector.load %arg8[%c0_21, %c0_22] : memref<8x128xf32, #tpu.memory_space<vmem>>, vector<8x128xf32>
    %cst_23 = arith.constant dense<0.000000e+00> : vector<40x128xf32>
    %40 = tpu.matmul %31, %39, %cst_23 {dimension_numbers = #tpu.dot_dimension_numbers<[1], [0], [0], [1], [0, 0, 1, 1], [], []>} : vector<40x8xf32>, vector<8x128xf32>, vector<40x128xf32> -> vector<40x128xf32>
    %41 = arith.addf %38, %40 : vector<40x128xf32>
    %c0_24 = arith.constant 0 : index
    %c0_25 = arith.constant 0 : index
    %c0_26 = arith.constant 0 : index
    %42 = vector.load %arg9[%c0_24, %c0_25, %c0_26] : memref<1x40x128xf32, #tpu.memory_space<vmem>>, vector<1x40x128xf32>
    %43 = vector.shape_cast %42 : vector<1x40x128xf32> to vector<40x128xf32>
    %44 = vector.shape_cast %41 : vector<40x128xf32> to vector<1x40x128xf32>
    tpu.vector_store %arg9[%c0_24, %c0_25, %c0_26], %44 {strides = array<i32>} : memref<1x40x128xf32, #tpu.memory_space<vmem>>, vector<1x40x128xf32>,
    return
  }
  func.func @transform_0(%arg0: i32, %arg1: i32) -> (i32, i32) {
    %c0_i32 = arith.constant 0 : i32
    %c0_i32_0 = arith.constant 0 : i32
    return %arg1, %c0_i32 : i32, i32
  }
  func.func @transform_1(%arg0: i32, %arg1: i32) -> (i32, i32) {
    %c0_i32 = arith.constant 0 : i32
    %c0_i32_0 = arith.constant 0 : i32
    return %arg1, %c0_i32 : i32, i32
  }
  func.func @transform_2(%arg0: i32, %arg1: i32) -> (i32, i32, i32) {
    %c0_i32 = arith.constant 0 : i32
    %c0_i32_0 = arith.constant 0 : i32
    %c0_i32_1 = arith.constant 0 : i32
    return %arg0, %c0_i32, %c0_i32_0 : i32, i32, i32
  }
  func.func @transform_3(%arg0: i32, %arg1: i32) -> (i32, i32) {
    %c0_i32 = arith.constant 0 : i32
    %c0_i32_0 = arith.constant 0 : i32
    %c0_i32_1 = arith.constant 0 : i32
    return %c0_i32, %c0_i32_0 : i32, i32
  }
  func.func @transform_4(%arg0: i32, %arg1: i32) -> (i32, i32) {
    %c0_i32 = arith.constant 0 : i32
    %c0_i32_0 = arith.constant 0 : i32
    %c0_i32_1 = arith.constant 0 : i32
    return %c0_i32, %c0_i32_0 : i32, i32
  }
  func.func @transform_5(%arg0: i32, %arg1: i32) -> (i32, i32) {
    %c0_i32 = arith.constant 0 : i32
    %c0_i32_0 = arith.constant 0 : i32
    %c0_i32_1 = arith.constant 0 : i32
    return %c0_i32, %c0_i32_0 : i32, i32
  }
  func.func @transform_6(%arg0: i32, %arg1: i32) -> (i32, i32) {
    %c0_i32 = arith.constant 0 : i32
    %c0_i32_0 = arith.constant 0 : i32
    %c0_i32_1 = arith.constant 0 : i32
    return %c0_i32, %c0_i32_0 : i32, i32
  }
  func.func @transform_7(%arg0: i32, %arg1: i32) -> (i32, i32, i32) {
    %c0_i32 = arith.constant 0 : i32
    %c0_i32_0 = arith.constant 0 : i32
    return %arg0, %arg1, %c0_i32 : i32, i32, i32
  }
}

</mosaic_0001>

<bundles_post_ra>
// kernel: tpu_custom_call.1
= control target key start
LH: loop header
LB: loop body
LE: loop exit
PB: predicated region body
PF: predicated region fallthrough
CT: control target
= control target key end

     0   :  { %12 = vsyncpa [#allocation3], 0  ;;  %s1557_s0 = inlined_call_operand.vmem [shape: s32[40,1], index: 0, kind: input, shape index: {}]   ;;  %s1558_s1 = inlined_call_operand.vmem [shape: s32[40,1], index: 1, kind: input, shape index: {}]   ;;  %s1559_s2 = inlined_call_operand.vmem [shape: bf16[2,8,32], index: 2, kind: input, shape index: {}]   ;;  %s1560_s3 = inlined_call_operand.vmem [shape: bf16[32,64], index: 3, kind: input, shape index: {}]   ;;  %s1561_s4 = inlined_call_operand.vmem [shape: f32[1,32], index: 4, kind: input, shape index: {}]   ;;  %s1562_s5 = inlined_call_operand.vmem [shape: bf16[32,128], index: 5, kind: input, shape index: {}]   ;;  %s1563_s6 = inlined_call_operand.vmem [shape: f32[8,128], index: 6, kind: input, shape index: {}]   ;;  %s1564_s7 = inlined_call_operand.hbm [shape: f32[2,40,128], index: 7, kind: output, shape index: {}]  }
   0x1   :  { %14 = vsyncpa [#allocation3 + $0x1], 0  ;;  %s1305_s24 = smov 0   ;;  %s1307_s25 = smov 0  }
   0x2   :  { %s1309_s26 = smov 0   ;;  %s1311_s27 = smov 0  }
   0x3   :  { %s1313_s28 = smov 0   ;;  %s1315_s29 = smov 0  }
   0x4 LB: > { %s963_s30 = sadd.s32 4294967295, %s1256_s29   ;;  %s964_s8 = sadd.s32 4294967294, %s1256_s29   ;;  %s1256_s29 = sphi %s1315_s29, %s20_s29   ;;  %s1252_s28 = sphi %s1313_s28, %s1571_s28   ;;  %s1248_s27 = sphi %s1311_s27, %s1570_s27   ;;  %s1244_s26 = sphi %s1309_s26, %s1569_s26   ;;  %s1240_s25 = sphi %s1307_s25, %s1568_s25   ;;  %s1236_s24 = sphi %s1305_s24, %s1567_s24  }
   0x5   : > { %s32_s9 = sadd.s32 1, %s1252_s28  ;;  %s203_s10 = sadd.s32 1, %s1244_s26 }
   0x6   : > { %p34_p0 = scmp.ge.s32.totalorder %s32_s9, 2  ;;  %p213_p1 = scmp.ne.s32.totalorder %s1244_s26, %s1240_s25 }
   0x7   : > { %p214_p2 = scmp.eq.s32.totalorder %s963_s30, 1  ;;  %p219_p3 = scmp.ne.s32.totalorder %s1240_s25, %s1236_s24 }
   0x8   : > { %s1573_s9 = smov (%p34_p0, %s32_s9), 0  ;;  %p220_p5 = scmp.eq.s32.totalorder %s964_s8, 1 }
   0x9   : > { %p1345_p4 = por %p214_p2, %p213_p1  ;;  %s198_s12 = ssub.s32 %s1252_s28, %s1573_s9 }
   0xa   : > { %p969_p6 = scmp.ge.s32.totalorder %s1256_s29, 1  ;;  %p201_p7 = scmp.eq.s32.totalorder %s198_s12, 0 }
   0xb   : > { %p1352_p8 = por %p220_p5, %p219_p3  ;;  %p275_p9 = scmp.lt.s32.totalorder %s1256_s29, 3 }
   0xc   : > { %s1358_s14 = scalar_select %p201_p7, %s1244_s26, %s203_s10  }
   0xd   : > { %p276_p10 = pnand %p969_p6, %p275_p9 }
   0xe   : > { %v1164_v0 = vld [vmem:[%s1560_s3] sm:$0xff] (!%p276_p10)   ;;  %v1258_v1 = vmov (!%p276_p10), 0.0   ;;  %v1165_v2 = vld [vmem:[%s1560_s3 + $0x8] sm:$0xff] (!%p276_p10)   ;;  %vm1259_vm0 = vmmov (!%p276_p10), 0   ;;  %p328_p11 = scmp.lt.s32.totalorder (!%p276_p10), %s1248_s27, 1  ;;  %v1260_v6 = vmov (!%p276_p10), 0   ;;  %v405_v26 = vlaneseq (!%p276_p10) }
   0xf   : > { %279 = sbr.rel (%p276_p10) target bundleno = 865 (0x361), region = 48  ;;  %1016 = vmatprep.subr.bf16.mxu0 (!%p276_p10), %v1258_v1  ;;  %1024 = vmatprep.subr.bf16.mxu1 (!%p276_p10), %v1258_v1  ;;  %v407_v3 = vld [vmem:[%s1557_s0] sm:$0xff] (!%p276_p10)  ;;  %v408_v5 = vld [vmem:[%s1557_s0 + $0x8] sm:$0xff] (!%p276_p10)  ;;  %vm351_vm1 = vcmask (!%p276_p10), 261120   ;;  %v410_v10 = vld [vmem:[%s1557_s0 + $0x18] sm:$0xff] (!%p276_p10)  ;;  %s1261_s16 = smov (!%p276_p10), 96  }
  0x10   : > { %1017 = vmatpush3.bf16.msra.mxu0 (!%p276_p10), %v1164_v0  ;;  %1020 = vmatprep.mubr.msk.bf16.mxu0 (!%p276_p10), %vm1259_vm0, %v1258_v1  ;;  %v412_v4 = vld [vmem:[%s1558_s1] sm:$0xff] (!%p276_p10)  ;;  %v413_v8 = vld [vmem:[%s1558_s1 + $0x8] sm:$0xff] (!%p276_p10)  ;;  %v415_v11 = vld [vmem:[%s1558_s1 + $0x18] sm:$0xff] (!%p276_p10)  ;;  %v1419_v28 = vand.u32 (!%p276_p10), 127, %v405_v26  ;;  %vm516_vm4 = vcmask (!%p276_p10), 1043456   ;;  %vm506_vm5 = vcmask (!%p276_p10), 64512  }
  0x11   : > { %1018 = vmatprep.subr.bf16.mxu0 (!%p276_p10), %v1258_v1  ;;  %1162 = vset.pattern.permute.xlu0 (!%p276_p10), %v1260_v6  ;;  %v445_v7 = vadd.s32 (!%p276_p10), %v412_v4, %v407_v3  ;;  %v446_v9 = vadd.s32 (!%p276_p10), %v413_v8, %v408_v5  ;;  %v448_v13 = vadd.s32 (!%p276_p10), %v415_v11, %v410_v10  ;;  %v409_v14 = vld [vmem:[%s1557_s0 + $0x10] sm:$0xff] (!%p276_p10)  ;;  %v411_v15 = vld [vmem:[%s1557_s0 + $0x20] sm:$0xff] (!%p276_p10)  ;;  %s1262_s23 = smov (!%p276_p10), [#allocation2]  }
  0x12   : > { %1163 = vset.pattern.permute.xlu1 (!%p276_p10), %v1260_v6  ;;  %1026 = vmatprep.mubr.msk.bf16.mxu1 (!%p276_p10), %vm1259_vm0, %v1258_v1  ;;  %v414_v16 = vld [vmem:[%s1558_s1 + $0x10] sm:$0xff] (!%p276_p10)  ;;  %v416_v23 = vld [vmem:[%s1558_s1 + $0x20] sm:$0xff] (!%p276_p10)  ;;  %s1182_s30 = sshll.u32 (!%p276_p10), %s1262_s23, 4  ;;  %s1183_s30 = int_to_ptr.vmem [resolvable:$false] %s1182_s30 }
  0x13   : > { %451 = vperm.xlu0 (!%p276_p10), %1162, %v445_v7   ;;  %v447_v21 = vadd.s32 (!%p276_p10), %v414_v16, %v409_v14  ;;  %v449_v24 = vadd.s32 (!%p276_p10), %v416_v23, %v411_v15  ;;  %v1415_v25 = vld [vmem:[%s1563_s6] sm:$0xff] (!%p276_p10)  ;;  %s1184_s8 = scalar_lea.vmem (!%p276_p10), %s1183_s30, 1280 }
  0x14   : > { %1019 = vmatpush3.bf16.msra.mxu0 (!%p276_p10), %v1165_v2  ;;  %v974_v29 = vld [vmem:[%s1561_s4] ss:$0 sm:$0xff] (!%p276_p10) }
  0x15   : > { %1052 = vmatprep.subr.mxu0 (!%p276_p10), %v1258_v1  ;;  %v1166_v7 = vld [vmem:[%s1562_s5] sm:$0xff] (!%p276_p10)  }
  0x16   : > { %s329_s12 = scalar_select %p328_p11, %s1248_s27, 1 }
  0x17   : > { %454 = vperm.xlu0 %1162, %v446_v9  }
  0x18   : > { %s970_s17 = sshll.u32 %s329_s12, 2  ;;  %s313_s12 = sand.u32 1, %s1240_s25  }
  0x19   : > { %s331_s22 = scalar_lea.vmem %s1559_s2, %s970_s17  ;;  %s1099_s15 = smul.u32 40, %s313_s12 }
  0x1a   : > { %v334_v12 = vld [vmem:[%s331_s22] sm:$0xf]  ;;  %s1100_s17 = smul.u32 640, %s1248_s27  ;;  %s1511_s22 = scalar_lea.sflag [#allocation3], %s313_s12 }
  0x1b   : > { %1021 = vmatmul.mubr.msk.bf16.vlgmr.msra.gmra.mrb[0].mxu0 %vm351_vm1, %v334_v12  ;;  %460 = vperm.xlu0 %1162, %v448_v13  }
  0x1c   : > { %1054 = vmatprep.mubr.msk.f32.mxu0 %vm1259_vm0, %v1258_v1  ;;  %1053 = vmatpush3.msra.mxu0 %v1415_v25  ;;  %s1509_s21 = scalar_lea.hbm %s1564_s7, %s1100_s17 }
  0x1d   : > { %1069 = vmatprep.subr.bf16.mxu0 %v1258_v1 }
  0x1f   : > { %418 = vperm.xlu0 %1162, %v407_v3  }
  0x23   : > { %424 = vperm.xlu0 %1162, %v409_v14  }
  0x27   : > { %430 = vperm.xlu0 %1162, %v411_v15  }
  0x2b   : > { %482 = vperm.xlu0 %1162, %v413_v8   ;;  %v1167_v8 = vld [vmem:[%s1562_s5 + $0x8] sm:$0xff]  }
  0x2f   : > { %488 = vperm.xlu0 %1162, %v415_v11  }
  0x92   : > { %v452_v27 = vpop.permute.xlu0 %451 }
  0x93   : > { %vm465_vm2 = vcmp.eq.s32.totalorder %v1419_v28, %v452_v27 }
  0x94   : > { %v470_v32 = vsel %vm465_vm2, 1.0, %v1258_v1 }
  0x96   : > { %v455_v30 = vpop.permute.xlu0 %454 }
  0x97   : > { %vm466_vm3 = vcmp.eq.s32.totalorder %v1419_v28, %v455_v30 }
  0x98   : > { %v471_v33 = vsel %vm466_vm3, 1.0, %v1258_v1 }
  0x99   : > { %v475_v36 = vpack.c.bf16 %v471_v33, %v470_v32 }
  0x9a   : > { %v461_v39 = vpop.permute.xlu0 %460 }
  0x9b   : > { %vm468_vm6 = vcmp.eq.s32.totalorder %v1419_v28, %v461_v39 }
  0x9c   : > { %v473_v42 = vsel %vm468_vm6, 1.0, %v1258_v1 }
  0x9e   : > { %v419_v40 = vpop.permute.xlu0 %418 }
  0x9f   : > { %vm432_vm10 = vcmp.eq.s32.totalorder %v1419_v28, %v419_v40 }
  0xa0   : > { %v437_v54 = vsel %vm432_vm10, 1.0, %v1258_v1 }
  0xa2   : > { %v425_v46 = vpop.permute.xlu0 %424 }
  0xa3   : > { %vm434_vm14 = vcmp.eq.s32.totalorder %v1419_v28, %v425_v46 }
  0xa4   : > { %v439_v62 = vsel %vm434_vm14, 1.0, %v1258_v1 }
  0xa6   : > { %v431_v50 = vpop.permute.xlu0 %430 }
  0xa7   : > { %vm436_vm3 = vcmp.eq.s32.totalorder %v1419_v28, %v431_v50 }
  0xa8   : > { %v441_v3 = vsel %vm436_vm3, 1.0, %v1258_v1 }
  0xaa   : > { %v483_v55 = vpop.permute.xlu0 %482 }
  0xab   : > { %vm494_vm12 = vcmp.eq.s32.totalorder %v1419_v28, %v483_v55 }
  0xac   : > { %v499_v59 = vsel %vm494_vm12, 1.0, %v1258_v1 }
  0xae   : > { %v489_v60 = vpop.permute.xlu0 %488 }
  0xaf   : > { %vm496_vm2 = vcmp.eq.s32.totalorder %v1419_v28, %v489_v60 }
  0xb0   : > { %v501_v2 = vsel %vm496_vm2, 1.0, %v1258_v1 }
  0xee   : > { %v389_v17 = vpop.f32.mrb[0].mxu0 }
  0xef   : > { %v1022_v18 = vpop.f32.mrb[1].mxu0  ;;  %v404_v19 = vpack.c.bf16 %v389_v17, %v389_v17  ;;  %v402_v31 = vadd.f32 %v974_v29, %v389_v17 }
  0xf0   : > { %v392_v20 = vpop.f32.mrb[2].mxu0 }
  0xf1   : > { %504 = vrot.lane.b32.xlu1 %v404_v19, %s1261_s16  ;;  %v1023_v22 = vpop.f32.mrb[3].mxu0  ;;  %v403_v35 = vpack.c.bf16 %v402_v31, %v402_v31  ;;  %s315_s16 = scalar_lea.vmem [#allocation2], %s1099_s15 }
  0xf2   : > { %s860_s18 = sshll.u32 %s315_s16, 4  ;;  %s1504_s18 = int_to_ptr.vmem [resolvable:$true] %s860_s18 }
  0xf3   : > { %v586_v38 = vsel %vm516_vm4, %v403_v35, 0  ;;  %s1178_s27 = scalar_lea.vmem %s1504_s18, 640  ;;  %p1185_p1 = scmp.lt.s32.totalorder %s1504_s18, %s1183_s30 }
  0xf4   : > { %p1179_p12 = scmp.ne.s32.totalorder %s1504_s18, %s1178_s27  ;;  %p1186_p2 = scmp.lt.s32.totalorder %s1184_s8, %s1178_s27 }
  0xf5   : > { %457 = vperm.xlu1 %1163, %v447_v21  }
  0xf6   : > { %p1180_p13 = pnand %p1179_p12, %p1345_p4  ;;  %p1187_p3 = por %p1186_p2, %p1185_p1 }
  0xf8   : > { %p1181_p0 = pneg %p1180_p13 }
  0xf9   : > { %463 = vperm.xlu1 %1163, %v449_v24  }
  0xfa   : > { %p1188_p5 = pnand %p1187_p3, %p1181_p0 }
  0xfd   : > { %421 = vperm.xlu1 %1163, %v408_v5  }
 0x101   : > { %427 = vperm.xlu1 %1163, %v410_v10  }
 0x105   : > { %479 = vperm.xlu1 %1163, %v412_v4   ;;  %v444_v4 = vpack.c.bf16 %v441_v3, %v441_v3 }
 0x109   : > { %485 = vperm.xlu1 %1163, %v414_v16  }
 0x10d   : > { %491 = vperm.xlu1 %1163, %v416_v23  }
 0x163   : > { %v505_v34 = vpop.permute.xlu1 %504 }
 0x164   : > { %v518_v37 = vsel %vm516_vm4, %v505_v34, 0 }
 0x165   : > { %1025 = vmatpush3.bf16.msra.mxu1 %v518_v37 }
 0x166   : > { %1038 = vmatprep.subr.bf16.mxu1 %v1258_v1 }
 0x168   : > { %1027 = vmatmul.mubr.msk.bf16.vlgmr.msra.gmra.mrb[0].mxu1 %vm506_vm5, %v475_v36 }
 0x169   : > { %1039 = vmatpush3.bf16.msra.mxu1 %v586_v38  ;;  %1030 = vmatprep.mubr.msk.bf16.mxu1 %vm1259_vm0, %v1258_v1 }
 0x16a   : > { %1085 = vmatprep.subr.mxu1 %v1258_v1 }
 0x174   : > { %v458_v41 = vpop.permute.xlu1 %457 }
 0x175   : > { %vm467_vm7 = vcmp.eq.s32.totalorder %v1419_v28, %v458_v41 }
 0x176   : > { %v472_v43 = vsel %vm467_vm7, 1.0, %v1258_v1 }
 0x177   : > { %v476_v44 = vpack.c.bf16 %v473_v42, %v472_v43 }
 0x178   : > { %v464_v45 = vpop.permute.xlu1 %463 }
 0x179   : > { %vm469_vm8 = vcmp.eq.s32.totalorder %v1419_v28, %v464_v45  ;;  %1031 = vmatmul.mubr.msk.bf16.gmra.mrb[4].mxu1 %vm506_vm5, %v476_v44 }
 0x17a   : > { %1034 = vmatprep.mubr.msk.bf16.mxu1 %vm1259_vm0, %v1258_v1  ;;  %v474_v47 = vsel %vm469_vm8, 1.0, %v1258_v1 }
 0x17b   : > { %v477_v49 = vpack.c.bf16 %v474_v47, %v474_v47 }
 0x17c   : > { %v422_v48 = vpop.permute.xlu1 %421 }
 0x17d   : > { %vm433_vm9 = vcmp.eq.s32.totalorder %v1419_v28, %v422_v48 }
 0x17e   : > { %v438_v52 = vsel %vm433_vm9, 1.0, %v1258_v1 }
 0x17f   : > { %v442_v57 = vpack.c.bf16 %v438_v52, %v437_v54 }
 0x180   : > { %v428_v51 = vpop.permute.xlu1 %427 }
 0x181   : > { %1035 = vmatmul.mubr.msk.bf16.gmra.mrb[8].mxu1 %vm506_vm5, %v477_v49  ;;  %vm435_vm13 = vcmp.eq.s32.totalorder %v1419_v28, %v428_v51 }
 0x182   : > { %1040 = vmatprep.mubr.msk.bf16.mxu1 %vm1259_vm0, %v1258_v1  ;;  %v440_v61 = vsel %vm435_vm13, 1.0, %v1258_v1 }
 0x183   : > { %v443_v0 = vpack.c.bf16 %v440_v61, %v439_v62 }
 0x184   : > { %v480_v53 = vpop.permute.xlu1 %479 }
 0x185   : > { %vm493_vm11 = vcmp.eq.s32.totalorder %v1419_v28, %v480_v53 }
 0x186   : > { %v498_v56 = vsel %vm493_vm11, 1.0, %v1258_v1 }
 0x187   : > { %1055 = vmatmul.mubr.msk.f32.vlgmr.msra.gmra.mrb[4].mxu0 %vm506_vm5, %v498_v56 }
 0x188   : > { %v486_v58 = vpop.permute.xlu1 %485  ;;  %1057 = vmatprep.mubr.msk.f32.mxu0 %vm1259_vm0, %v1258_v1  ;;  %1070 = vmatpush3.bf16.msra.mxu0 %v1166_v7 }
 0x189   : > { %1041 = vmatmul.mubr.msk.bf16.vlgmr.msra.gmra.mrb[0].mxu1 %vm506_vm5, %v442_v57  ;;  %vm495_vm15 = vcmp.eq.s32.totalorder %v1419_v28, %v486_v58  ;;  %1071 = vmatprep.subr.bf16.mxu0 %v1258_v1 }
 0x18a   : > { %1044 = vmatprep.mubr.msk.bf16.mxu1 %vm1259_vm0, %v1258_v1  ;;  %1086 = vmatpush3.msra.mxu1 %v1415_v25  ;;  %v500_v63 = vsel %vm495_vm15, 1.0, %v1258_v1 }
 0x18b   : > { %1058 = vmatmul.mubr.msk.f32.gmra.mrb[6].mxu0 %vm506_vm5, %v499_v59 }
 0x18c   : > { %1060 = vmatprep.mubr.msk.f32.mxu0 %vm1259_vm0, %v1258_v1  ;;  %v492_v5 = vpop.permute.xlu1 %491  ;;  %1072 = vmatpush3.bf16.msra.mxu0 %v1167_v8 }
 0x18d   : > { %vm497_vm4 = vcmp.eq.s32.totalorder %v1419_v28, %v492_v5 }
 0x18e   : > { %v502_v6 = vsel %vm497_vm4, 1.0, %v1258_v1 }
 0x18f   : > { %1061 = vmatmul.mubr.msk.f32.gmra.mrb[8].mxu0 %vm506_vm5, %v500_v63 }
 0x190   : > { %1063 = vmatprep.mubr.msk.f32.mxu0 %vm1259_vm0, %v1258_v1 }
 0x191   : > { %1045 = vmatmul.mubr.msk.bf16.gmra.mrb[4].mxu1 %vm506_vm5, %v443_v0 }
 0x192   : > { %1048 = vmatprep.mubr.msk.bf16.mxu1 %vm1259_vm0, %v1258_v1 }
 0x193   : > { %1064 = vmatmul.mubr.msk.f32.gmra.mrb[10].mxu0 %vm506_vm5, %v501_v2 }
 0x194   : > { %1073 = vmatprep.mubr.msk.bf16.mxu0 %vm1259_vm0, %v1258_v1 }
 0x199   : > { %1049 = vmatmul.mubr.msk.bf16.gmra.mrb[8].mxu1 %vm506_vm5, %v444_v4 }
 0x19a   : > { %1066 = vmatprep.mubr.msk.f32.mxu1 %vm1259_vm0, %v1258_v1 }
 0x1a1   : > { %1067 = vmatmul.mubr.msk.f32.vlgmr.msra.gmra.mrb[12].mxu1 %vm506_vm5, %v502_v6 }
 0x25a   : > { %v738_v9 = vpop.f32.mrb[4].mxu0 }
 0x25b   : > { %v1056_v10 = vpop.f32.mrb[5].mxu0 }
 0x25c   : > { %v622_v11 = vpop.f32.mrb[0].mxu1 }
 0x25d   : > { %v1042_v12 = vpop.f32.mrb[1].mxu1  ;;  %1168 = vtanh.f32 %v622_v11 }
 0x25e   : > { %v625_v13 = vpop.f32.mrb[2].mxu1  ;;  %v743_v14 = vpop.f32.mrb[6].mxu0 }
 0x25f   : > { %1170 = vtanh.f32 %v625_v13  ;;  %v1043_v15 = vpop.f32.mrb[3].mxu1  ;;  %v1059_v16 = vpop.f32.mrb[7].mxu0 }
 0x262   : > { %v748_v17 = vpop.f32.mrb[8].mxu0 }
 0x263   : > { %v1062_v18 = vpop.f32.mrb[9].mxu0 }
 0x264   : > { %v630_v19 = vpop.f32.mrb[4].mxu1 }
 0x265   : > { %v1046_v20 = vpop.f32.mrb[5].mxu1  ;;  %1172 = vtanh.f32 %v630_v19 }
 0x266   : > { %v633_v21 = vpop.f32.mrb[6].mxu1  ;;  %v753_v22 = vpop.f32.mrb[10].mxu0 }
 0x267   : > { %1174 = vtanh.f32 %v633_v21  ;;  %v1047_v23 = vpop.f32.mrb[7].mxu1  ;;  %v1065_v24 = vpop.f32.mrb[11].mxu0 }
 0x268   : > { %v1169_v25 = vpop.eup %1168 }
 0x269   : > { %v1171_v26 = vpop.eup %1170 }
 0x26a   : > { %v649_v27 = vpack.c.bf16 %v1171_v26, %v1169_v25 }
 0x26c   : > { %v638_v28 = vpop.f32.mrb[8].mxu1  ;;  %1074 = vmatmul.mubr.msk.bf16.vlgmr.msra.gmra.mrb[12].mxu0 %vm351_vm1, %v649_v27 }
 0x26d   : > { %1176 = vtanh.f32 %v638_v28  ;;  %v1050_v29 = vpop.f32.mrb[9].mxu1  ;;  %1077 = vmatprep.mubr.msk.bf16.mxu0 %vm1259_vm0, %v1258_v1 }
 0x26e   : > { %v641_v30 = vpop.f32.mrb[10].mxu1 }
 0x26f   : > { %v1051_v31 = vpop.f32.mrb[11].mxu1  ;;  %v1173_v32 = vpop.eup %1172 }
 0x271   : > { %v1175_v33 = vpop.eup %1174 }
 0x272   : > { %v650_v34 = vpack.c.bf16 %v1175_v33, %v1173_v32 }
 0x274   : > { %v758_v35 = vpop.f32.mrb[12].mxu1  ;;  %1078 = vmatmul.mubr.msk.bf16.gmra.mrb[16].mxu0 %vm351_vm1, %v650_v34 }
 0x275   : > { %v1068_v36 = vpop.f32.mrb[13].mxu1  ;;  %1081 = vmatprep.mubr.msk.bf16.mxu0 %vm1259_vm0, %v1258_v1 }
 0x277   : > { %v1177_v37 = vpop.eup %1176 }
 0x278   : > { %v651_v38 = vpack.c.bf16 %v1177_v37, %v1177_v37 }
 0x27c   : > { %1082 = vmatmul.mubr.msk.bf16.gmra.mrb[20].mxu0 %vm351_vm1, %v651_v38 }
 0x33f   : > { %v817_v39 = vpop.f32.mrb[12].mxu0 }
 0x340   : > { %v818_v40 = vadd.f32 %v817_v39, %v738_v9  ;;  %v1075_v41 = vpop.f32.mrb[13].mxu0 }
 0x341   : > { %v820_v42 = vpop.f32.mrb[14].mxu0 }
 0x342   : > { %839 = vst [vmem:[%s315_s16] sm:$0xff] %v818_v40  ;;  %v821_v43 = vadd.f32 %v820_v42, %v743_v14  ;;  %v1076_v44 = vpop.f32.mrb[15].mxu0 }
 0x344   : > { %840 = vst [vmem:[%s315_s16 + $0x8] sm:$0xff] %v821_v43 }
 0x347   : > { %v825_v45 = vpop.f32.mrb[16].mxu0 }
 0x348   : > { %v826_v46 = vadd.f32 %v825_v45, %v748_v17  ;;  %v1079_v47 = vpop.f32.mrb[17].mxu0 }
 0x349   : > { %v828_v1 = vpop.f32.mrb[18].mxu0 }
 0x34a   : > { %841 = vst [vmem:[%s315_s16 + $0x10] sm:$0xff] %v826_v46  ;;  %v829_v48 = vadd.f32 %v828_v1, %v753_v22  ;;  %v1080_v49 = vpop.f32.mrb[19].mxu0 }
 0x34c   : > { %842 = vst [vmem:[%s315_s16 + $0x18] sm:$0xff] %v829_v48 }
 0x34f   : > { %v833_v50 = vpop.f32.mrb[20].mxu0 }
 0x350   : > { %v834_v51 = vadd.f32 %v833_v50, %v758_v35  ;;  %v1083_v52 = vpop.f32.mrb[21].mxu0 }
 0x351   : > { %v836_v53 = vpop.f32.mrb[22].mxu0 }
 0x352   : > { %843 = vst [vmem:[%s315_s16 + $0x20] sm:$0xff] %v834_v51  ;;  %v1084_v54 = vpop.f32.mrb[23].mxu0 }
 0x353   : > { %1191 = shalt.err (!%p1188_p5)
}
 0x354   : > { %s1192_s10 = scalar_lea.hbm %s1509_s21, 640  ;;  %s1196_s16 = scalar_lea.hbm %s1564_s7, 1280 }
 0x355   : > { %p1193_p6 = scmp.ne.s32.totalorder %s1509_s21, %s1192_s10  ;;  %p1197_p10 = scmp.lt.u32.totalorder %s1509_s21, %s1564_s7 }
 0x356   : > { %p1198_p11 = scmp.lt.u32.totalorder %s1196_s16, %s1192_s10  ;;  %p1200_p13 = scmp.lt.u32.totalorder %s1192_s10, %s1509_s21 }
 0x357   : > { %p1194_p7 = pnand %p1193_p6, %p1345_p4 }
 0x358   : > { %p1199_p12 = por %p1198_p11, %p1197_p10 }
 0x359   : > { %p1195_p9 = pneg %p1194_p7 }
 0x35a   : > { %p1201_p0 = por %p1200_p13, %p1199_p12 }
 0x35c   : > { %p1202_p1 = pnand %p1201_p0, %p1195_p9 }
 0x35e   : > { %1205 = shalt.err (!%p1202_p1)
}
 0x35f   : > { %s1263_s20 = smov 128   ;;  %s1264_s27 = smov 8  }
 0x360   : > { %1101 = dma.vmem_to_hbm [thread:$0]  (%p1345_p4), %s1504_s18, 640, %s1509_s21, %s1511_s22, %s1263_s20, %s1263_s20, %s1264_s27  }
 0x361 PF: > { %p1107_p2 = scmp.ge.s32.totalorder %s1256_s29, 2  ;;  %s875_s23 = sand.u32 1, %s1236_s24  }
 0x362   : > { %s876_s30 = scalar_lea.sflag [#allocation3], %s875_s23 }
 0x363   : > { %p1104_p3 = pnand %p1107_p2, %p1352_p8 }
 0x365   : > { %1231 = dma.done.wait (!%p1104_p3), %s876_s30, 640  }
 0x366   : > { %1233 = vsyncadd (!%p1104_p3), %s876_s30, 4294966656  ;;  %s20_s29 = sadd.s32 1, %s1256_s29   ;;  %s1567_s24 = smov %s1240_s25 }
 0x367   : > { %p17_p5 = scmp.ge.s32.totalorder %s20_s29, 4   ;;  %s1568_s25 = smov %s1244_s26 }
 0x368   : > { %s1569_s26 = smov %s1358_s14  ;;  %s1570_s27 = smov %s1252_s28 }
 0x369   : > { %s1571_s28 = smov %s1573_s9  ;;  %19 = sbr.rel (!%p17_p5) target bundleno = 4 (0x4), region = 89 }
 0x370   :  { %881 = vsyncpa [#allocation3], 1 }
 0x371   :  { %883 = vsyncpa [#allocation3 + $0x1], 1 }

</bundles_post_ra>
